<compile_context>
chip_gen: v6e
topology: v6e:2x2x1
jax: 0.10.0
libtpu: 0.0.40
codegen_flags: <defaults>
</compile_context>

<pallas_src>
import functools
import math

import jax
import jax.numpy as jnp
from jax import lax
from jax.experimental import pallas as pl
from jax.experimental.pallas import tpu as pltpu


def _ceil_to(x, m):
    return ((x + m - 1) // m) * m


def score_kernel(n, x_ref, w_ref, o_ref):
    """x_ref: (block_n, F) rows; w_ref: (1, F) scorer; o_ref: (block_n//128, 128)."""
    block_n = x_ref.shape[0]
    w = w_ref[...]
    w32 = w.astype(jnp.float32)
    inv_norm = lax.rsqrt(jnp.sum(w32 * w32))                  # 1 / ||scorer||
    # (1, F) x (block_n, F) contracting F -> (1, block_n): lane-dense row from
    # the MXU (low MXU utilization is fine; this pass is HBM bound).  No forced
    # f32 cast of x: bf16 inputs stay MXU-native, accumulation is f32.
    s = lax.dot_general(w.astype(x_ref.dtype), x_ref[...],
                        (((1,), (1,)), ((), ())),
                        preferred_element_type=jnp.float32)
    s = s * inv_norm
    # Mask padded rows to -inf at store time so pass 2 drops its init mask.
    base = pl.program_id(0) * block_n
    lane = base + lax.broadcasted_iota(jnp.int32, (1, block_n), 1)
    s = jnp.where(lane < n, s, -jnp.inf)
    # Repack lane-extended -> sublane-dense: one static (1, 128) store per row.
    for r in range(block_n // 128):
        o_ref[pl.ds(r, 1), :] = s[:, r * 128:(r + 1) * 128]


def select_gather_kernel(n, k, depth, scores_ref, x_hbm, o_ref,
                         s_scr, bm_scr, idx_smem, val_smem, rowbuf, sem):
    """scores_ref: (R, 128) sublane-dense scores (VMEM, padded slots = -inf);
    x_hbm: (n_pad, F) node rows in HBM; o_ref: (k, F) selected rows * tanh(score);
    s_scr: (R, 128) working copy; bm_scr: (1, B) per-(8x128)-block maxima;
    idx_smem/val_smem: (k,) selected indices / scores (SMEM);
    rowbuf: (depth, 1, F) DMA landing buffers; sem: depth DMA semaphores."""
    n_blocks = bm_scr.shape[1]
    neg_inf = jnp.float32(-jnp.inf)

    biota = lax.broadcasted_iota(jnp.int32, (1, n_blocks), 1)
    flat8 = (lax.broadcasted_iota(jnp.int32, (8, 128), 0) * 128
             + lax.broadcasted_iota(jnp.int32, (8, 128), 1))

    # --- init: working copy + per-block maxima --------------------------------
    s_scr[...] = scores_ref[...]

    def init_body(b, _):
        row0 = pl.multiple_of(b * 8, 8)
        blk = s_scr[pl.ds(row0, 8), :]
        pltpu.store(bm_scr,
                    jnp.full((1, n_blocks), jnp.max(blk), jnp.float32),
                    mask=biota == b)
        return 0

    lax.fori_loop(0, n_blocks, init_body, 0)

    # --- phase A: serial top-k selection via two-level argmax -----------------
    def sel_body(t, carry):
        pj, pv = carry
        bm = bm_scr[...]                                      # (1, B) scan
        m = jnp.max(bm)
        b = jnp.min(jnp.where(bm == m, biota, n_blocks))      # first winning block
        b = jnp.minimum(b, n_blocks - 1)                      # NaN / degenerate safety
        row0 = pl.multiple_of(b * 8, 8)
        blk = s_scr[pl.ds(row0, 8), :]                        # one 8x128 vreg
        loc = jnp.min(jnp.where(blk == m, flat8, 8 * 128))    # first occurrence
        loc = jnp.minimum(loc, 8 * 128 - 1)
        j = jnp.minimum(b * 1024 + loc, n - 1)                # never OOB
        valid = m > neg_inf
        # PyTorch `vals > -inf` filter + pad_with_last_val: once the running max
        # is -inf, keep re-emitting the last picked row with its original score.
        j = jnp.where(valid, j, pj)
        v = jnp.where(valid, m, pv)

        @pl.when(valid)
        def _():
            # Narrow knockout: rewrite only the winning block and refresh its
            # cached maximum (no full-row compare / masked store per pick).
            blk_new = jnp.where(flat8 == loc, neg_inf, blk)
            s_scr[pl.ds(row0, 8), :] = blk_new
            pltpu.store(bm_scr,
                        jnp.full((1, n_blocks), jnp.max(blk_new), jnp.float32),
                        mask=biota == b)

        idx_smem[t] = j
        val_smem[t] = v
        return j, v

    lax.fori_loop(0, k, sel_body, (jnp.int32(0), neg_inf))
    # TODO(synk): torch.topk treats NaN scores as largest; here NaNs fall into
    # the degenerate/pad path instead of being selected.

    # --- phase B: gather the k rows with a depth-deep DMA pipeline ------------
    def start_fetch(t, slot):
        pltpu.make_async_copy(x_hbm.at[pl.ds(idx_smem[t], 1), :],
                              rowbuf.at[slot], sem.at[slot]).start()

    def wait_fetch(slot):
        pltpu.make_async_copy(x_hbm.at[pl.ds(0, 1), :],
                              rowbuf.at[slot], sem.at[slot]).wait()

    for t in range(min(depth, k)):                            # prime the pipeline
        start_fetch(t, t)

    def emit_body(t, _):
        slot = t % depth
        wait_fetch(slot)
        row = rowbuf[slot].astype(jnp.float32)                # (1, F)
        scale = jnp.tanh(jnp.full((1, 1), val_smem[t], jnp.float32))
        o_ref[pl.ds(t, 1), :] = (row * scale).astype(o_ref.dtype)

        @pl.when(t + depth < k)
        def _():
            start_fetch(t + depth, slot)                      # refill this slot
        return 0

    lax.fori_loop(0, k, emit_body, 0)


def topk_forward(node_embs, scorer, k, *, block_target_bytes=2 << 20):
    """node_embs: (N, F), scorer: (F, 1) -> (F, k), matching TopK.forward."""
    n, f = node_embs.shape
    assert 1 <= k <= n
    itemsize = jnp.dtype(node_embs.dtype).itemsize

    # Pass-1 block: ~1-2 MiB of input rows (HBM roofline), multiple of 1024 so
    # every pass-2 8x128 score block is full; capped so the static repack loop
    # in score_kernel stays small.
    block_n = _ceil_to(max(block_target_bytes // (f * itemsize), 1024), 1024)
    block_n = min(block_n, 8192)
    n_pad = _ceil_to(n, 1024)
    block_n = min(block_n, n_pad)
    n_pad = _ceil_to(n_pad, block_n)
    x_pad = node_embs if n_pad == n else jnp.pad(node_embs, ((0, n_pad - n), (0, 0)))
    scorer_row = scorer.T                                     # (1, F) layout glue

    r_total = n_pad // 128
    rows_per_block = block_n // 128
    n_blocks = n_pad // 1024

    # Pass 1: tiled, double-buffered scoring (megacore-parallel over row blocks),
    # output already sublane-dense and -inf-masked for padded rows.
    scores2d = pl.pallas_call(
        functools.partial(score_kernel, n),
        out_shape=jax.ShapeDtypeStruct((r_total, 128), jnp.float32),
        grid=(n_pad // block_n,),
        in_specs=[pl.BlockSpec((block_n, f), lambda i: (i, 0)),
                  pl.BlockSpec((1, f), lambda i: (0, 0))],
        out_specs=pl.BlockSpec((rows_per_block, 128), lambda i: (i, 0)),
        compiler_params=pltpu.CompilerParams(
            dimension_semantics=("parallel",)),
    )(x_pad, scorer_row)

    # Pass 2: two-level top-k selection + 4-deep pipelined row gather from HBM
    # (node_embs are never fully staged into VMEM).
    depth = 4
    vmem_needed = (2 * r_total * 128 * 4 + depth * f * itemsize
                   + k * f * itemsize + (2 << 20))
    cp_kwargs = {}
    if vmem_needed > (30 << 20):
        cp_kwargs["vmem_limit_bytes"] = int(min(vmem_needed, 60 << 20))
    # TODO(synk): for n_pad in the multi-million range, keep the scores in HBM
    # (pl.ANY) and stream only the per-block maxima into VMEM (v7x 64 MiB VMEM).

    out_kf = pl.pallas_call(
        functools.partial(select_gather_kernel, n, k, depth),
        out_shape=jax.ShapeDtypeStruct((k, f), node_embs.dtype),
        in_specs=[pl.BlockSpec(memory_space=pltpu.MemorySpace.VMEM),
                  pl.BlockSpec(memory_space=pl.ANY)],
        out_specs=pl.BlockSpec(memory_space=pltpu.MemorySpace.VMEM),
        scratch_shapes=[pltpu.VMEM((r_total, 128), jnp.float32),
                        pltpu.VMEM((1, n_blocks), jnp.float32),
                        pltpu.SMEM((k,), jnp.int32),
                        pltpu.SMEM((k,), jnp.float32),
                        pltpu.VMEM((depth, 1, f), node_embs.dtype),
                        pltpu.SemaphoreType.DMA((depth,))],
        compiler_params=pltpu.CompilerParams(**cp_kwargs),
    )(scores2d, x_pad)

    # The module returns out.t(): (F, k).  The kernel writes (k, F) so the row
    # stores stay lane-dense; the tiny transpose stays in plain JAX.
    return out_kf.T


def topk_reference(node_embs, scorer, k):
    scores = jnp.sum(node_embs * scorer.reshape(1, -1), axis=1)
    scores = scores / jnp.linalg.norm(scorer)
    vals, idx = lax.top_k(scores, k)
    out = node_embs[idx] * jnp.tanh(vals)[:, None]
    return out.T


def _run_case(key, n, feats, k, tag, **kw):
    k_x, k_w = jax.random.split(key)
    node_embs = jax.random.normal(k_x, (n, feats), dtype=jnp.float32)
    stdv = 1.0 / math.sqrt(feats)
    scorer = jax.random.uniform(k_w, (feats, 1), dtype=jnp.float32,
                                minval=-stdv, maxval=stdv)
    out = jax.block_until_ready(topk_forward(node_embs, scorer, k, **kw))
    ref = topk_reference(node_embs, scorer, k)
    assert out.shape == (feats, k), (tag, out.shape)
    # tolerance headroom covers MXU f32 multi-pass rounding in the scoring matmul
    assert jnp.allclose(out, ref, atol=5e-3, rtol=5e-3), (
        tag, float(jnp.max(jnp.abs(out - ref))))


if __name__ == "__main__":
    key = jax.random.PRNGKey(0)
    k0, k1, k2 = jax.random.split(key, 3)
    _run_case(k0, 16, 32, 8, "small")      # toy shape consistent with the module
    _run_case(k1, 600, 128, 16, "padded")  # row padding / -inf masking
    # Small block target to exercise a multi-step grid, multi-block two-level
    # argmax and last-block masking at test-friendly sizes.
    _run_case(k2, 2500, 64, 12, "tiled", block_target_bytes=1 << 18)
    print("KERNEL_OK")
</pallas_src>

<mosaic_0001>
module attributes {stable_mosaic.version = 11 : i64} {
  func.func @score_kernel(%arg0: i32, %arg1: memref<1024x32xf32, #tpu.memory_space<vmem>>, %arg2: memref<1x32xf32, #tpu.memory_space<vmem>>, %arg3: memref<8x128xf32, #tpu.memory_space<vmem>>) attributes {dimension_semantics = [#tpu.dimension_semantics<parallel>], iteration_bounds = array<i64: 1>, scalar_prefetch = 0 : i64, scratch_operands = 0 : i64, tpu.core_type = #tpu.core_type<tc>, window_params = [{transform_indices = @transform_0, window_bounds = array<i64: 1024, 32>}, {pipeline_mode = #tpu.pipeline_mode<synchronous>, transform_indices = @transform_1, window_bounds = array<i64: 1, 32>}, {transform_indices = @transform_2, window_bounds = array<i64: 8, 128>}]} {
    %c0 = arith.constant 0 : index
    %c0_0 = arith.constant 0 : index
    %0 = vector.load %arg2[%c0, %c0_0] : memref<1x32xf32, #tpu.memory_space<vmem>>, vector<1x32xf32>
    %1 = arith.mulf %0, %0 : vector<1x32xf32>
    %2 = vector.shape_cast %1 : vector<1x32xf32> to vector<1x1x32xf32>
    %cst = arith.constant dense<0.000000e+00> : vector<1xf32>
    %3 = vector.multi_reduction <add>, %2, %cst [1, 2] : vector<1x1x32xf32> to vector<1xf32>
    %4 = vector.shape_cast %3 : vector<1xf32> to vector<1x1x1xf32>
    %5 = vector.extract %4[0, 0, 0] : f32 from vector<1x1x1xf32>
    %6 = math.rsqrt %5 : f32
    %c0_1 = arith.constant 0 : index
    %c0_2 = arith.constant 0 : index
    %7 = vector.load %arg1[%c0_1, %c0_2] : memref<1024x32xf32, #tpu.memory_space<vmem>>, vector<1024x32xf32>
    %cst_3 = arith.constant dense<0.000000e+00> : vector<1x1024xf32>
    %8 = tpu.matmul %0, %7, %cst_3 {dimension_numbers = #tpu.dot_dimension_numbers<[1], [1], [0], [0], [0, 0, 1, 0], [], []>} : vector<1x32xf32>, vector<1024x32xf32>, vector<1x1024xf32> -> vector<1x1024xf32>
    %9 = vector.broadcast %6 : f32 to vector<1x1024xf32>
    %10 = arith.mulf %8, %9 : vector<1x1024xf32>
    %c1024_i32 = arith.constant 1024 : i32
    %11 = arith.muli %arg0, %c1024_i32 : i32
    %12 = tpu.iota {dimensions = array<i32: 1>} : vector<1x1024xi32>
    %13 = vector.broadcast %11 : i32 to vector<1x1024xi32>
    %14 = arith.addi %13, %12 : vector<1x1024xi32>
    %c16_i32 = arith.constant 16 : i32
    %15 = vector.broadcast %c16_i32 : i32 to vector<1x1024xi32>
    %16 = arith.cmpi slt, %14, %15 : vector<1x1024xi32>
    %cst_4 = arith.constant 0xFF800000 : f32
    %17 = vector.broadcast %cst_4 : f32 to vector<1x1024xf32>
    %18 = arith.select %16, %10, %17 : vector<1x1024xi1>, vector<1x1024xf32>
    %19 = vector.extract_strided_slice %18 {offsets = [0, 0], sizes = [1, 128], strides = [1, 1]} : vector<1x1024xf32> to vector<1x128xf32>
    %c0_5 = arith.constant 0 : index
    %c0_6 = arith.constant 0 : index
    %20 = vector.load %arg3[%c0_5, %c0_6] : memref<8x128xf32, #tpu.memory_space<vmem>>, vector<1x128xf32>
    tpu.vector_store %arg3[%c0_5, %c0_6], %19 {strides = array<i32>} : memref<8x128xf32, #tpu.memory_space<vmem>>, vector<1x128xf32>,
    %21 = vector.extract_strided_slice %18 {offsets = [0, 128], sizes = [1, 128], strides = [1, 1]} : vector<1x1024xf32> to vector<1x128xf32>
    %c1 = arith.constant 1 : index
    %c0_7 = arith.constant 0 : index
    %22 = vector.load %arg3[%c1, %c0_7] : memref<8x128xf32, #tpu.memory_space<vmem>>, vector<1x128xf32>
    tpu.vector_store %arg3[%c1, %c0_7], %21 {strides = array<i32>} : memref<8x128xf32, #tpu.memory_space<vmem>>, vector<1x128xf32>,
    %23 = vector.extract_strided_slice %18 {offsets = [0, 256], sizes = [1, 128], strides = [1, 1]} : vector<1x1024xf32> to vector<1x128xf32>
    %c2 = arith.constant 2 : index
    %c0_8 = arith.constant 0 : index
    %24 = vector.load %arg3[%c2, %c0_8] : memref<8x128xf32, #tpu.memory_space<vmem>>, vector<1x128xf32>
    tpu.vector_store %arg3[%c2, %c0_8], %23 {strides = array<i32>} : memref<8x128xf32, #tpu.memory_space<vmem>>, vector<1x128xf32>,
    %25 = vector.extract_strided_slice %18 {offsets = [0, 384], sizes = [1, 128], strides = [1, 1]} : vector<1x1024xf32> to vector<1x128xf32>
    %c3 = arith.constant 3 : index
    %c0_9 = arith.constant 0 : index
    %26 = vector.load %arg3[%c3, %c0_9] : memref<8x128xf32, #tpu.memory_space<vmem>>, vector<1x128xf32>
    tpu.vector_store %arg3[%c3, %c0_9], %25 {strides = array<i32>} : memref<8x128xf32, #tpu.memory_space<vmem>>, vector<1x128xf32>,
    %27 = vector.extract_strided_slice %18 {offsets = [0, 512], sizes = [1, 128], strides = [1, 1]} : vector<1x1024xf32> to vector<1x128xf32>
    %c4 = arith.constant 4 : index
    %c0_10 = arith.constant 0 : index
    %28 = vector.load %arg3[%c4, %c0_10] : memref<8x128xf32, #tpu.memory_space<vmem>>, vector<1x128xf32>
    tpu.vector_store %arg3[%c4, %c0_10], %27 {strides = array<i32>} : memref<8x128xf32, #tpu.memory_space<vmem>>, vector<1x128xf32>,
    %29 = vector.extract_strided_slice %18 {offsets = [0, 640], sizes = [1, 128], strides = [1, 1]} : vector<1x1024xf32> to vector<1x128xf32>
    %c5 = arith.constant 5 : index
    %c0_11 = arith.constant 0 : index
    %30 = vector.load %arg3[%c5, %c0_11] : memref<8x128xf32, #tpu.memory_space<vmem>>, vector<1x128xf32>
    tpu.vector_store %arg3[%c5, %c0_11], %29 {strides = array<i32>} : memref<8x128xf32, #tpu.memory_space<vmem>>, vector<1x128xf32>,
    %31 = vector.extract_strided_slice %18 {offsets = [0, 768], sizes = [1, 128], strides = [1, 1]} : vector<1x1024xf32> to vector<1x128xf32>
    %c6 = arith.constant 6 : index
    %c0_12 = arith.constant 0 : index
    %32 = vector.load %arg3[%c6, %c0_12] : memref<8x128xf32, #tpu.memory_space<vmem>>, vector<1x128xf32>
    tpu.vector_store %arg3[%c6, %c0_12], %31 {strides = array<i32>} : memref<8x128xf32, #tpu.memory_space<vmem>>, vector<1x128xf32>,
    %33 = vector.extract_strided_slice %18 {offsets = [0, 896], sizes = [1, 128], strides = [1, 1]} : vector<1x1024xf32> to vector<1x128xf32>
    %c7 = arith.constant 7 : index
    %c0_13 = arith.constant 0 : index
    %34 = vector.load %arg3[%c7, %c0_13] : memref<8x128xf32, #tpu.memory_space<vmem>>, vector<1x128xf32>
    tpu.vector_store %arg3[%c7, %c0_13], %33 {strides = array<i32>} : memref<8x128xf32, #tpu.memory_space<vmem>>, vector<1x128xf32>,
    return
  }
  func.func @transform_0(%arg0: i32) -> (i32, i32) {
    %c0_i32 = arith.constant 0 : i32
    %c0_i32_0 = arith.constant 0 : i32
    return %arg0, %c0_i32 : i32, i32
  }
  func.func @transform_1(%arg0: i32) -> (i32, i32) {
    %c0_i32 = arith.constant 0 : i32
    %c0_i32_0 = arith.constant 0 : i32
    %c0_i32_1 = arith.constant 0 : i32
    return %c0_i32, %c0_i32_0 : i32, i32
  }
  func.func @transform_2(%arg0: i32) -> (i32, i32) {
    %c0_i32 = arith.constant 0 : i32
    %c0_i32_0 = arith.constant 0 : i32
    return %arg0, %c0_i32 : i32, i32
  }
}

</mosaic_0001>

<bundles_post_ra>
// kernel: tpu_custom_call.1
= control target key start
LH: loop header
LB: loop body
LE: loop exit
PB: predicated region body
PF: predicated region fallthrough
CT: control target
= control target key end

     0   :  { %vm156_vm0 = vcmask 261120   ;;  %vm14_vm1 = vcmask 253952   ;;  %s1747_s0 = inlined_call_operand.vmem [shape: f32[1024,32], index: 0, kind: input, shape index: {}]   ;;  %s1748_s1 = inlined_call_operand.vmem [shape: f32[1,32], index: 1, kind: input, shape index: {}]   ;;  %s1749_s2 = inlined_call_operand.hbm [shape: f32[8,128], index: 2, kind: output, shape index: {}]  }
   0x1   :  { %v59_v0 = vld [vmem:[%s1747_s0 + $0xf8] sm:$0xff]  ;;  %v1226_v4 = vld [vmem:[%s1748_s1] sm:$0x1]  ;;  %v58_v5 = vld [vmem:[%s1747_s0 + $0xf0] sm:$0xff] }
   0x2   :  { %v91_v1 = vld [vmem:[%s1747_s0 + $0x1f8] sm:$0xff]  ;;  %1026 = vmatprep.subr.msk.mxu0 %vm156_vm0, %v59_v0  ;;  %v13_v6 = vmul.f32 %v1226_v4, %v1226_v4  ;;  %v90_v7 = vld [vmem:[%s1747_s0 + $0x1f0] sm:$0xff]  ;;  %v57_v11 = vld [vmem:[%s1747_s0 + $0xe8] sm:$0xff]  ;;  %1058 = vmatprep.mubr.msk.f32.mxu0 %vm156_vm0, %v1226_v4 }
   0x3   :  { %v43_v2 = vld [vmem:[%s1747_s0 + $0x78] sm:$0xff]  ;;  %1060 = vmatprep.subr.msk.mxu1 %vm156_vm0, %v91_v1  ;;  %v42_v8 = vld [vmem:[%s1747_s0 + $0x70] sm:$0xff]  ;;  %v89_v12 = vld [vmem:[%s1747_s0 + $0x1e8] sm:$0xff]  ;;  %1092 = vmatprep.mubr.msk.f32.mxu1 %vm156_vm0, %v1226_v4 }
   0x4   :  { %v75_v3 = vld [vmem:[%s1747_s0 + $0x178] sm:$0xff]  ;;  %1027 = vmatpush3.xpose.msk.msra.mxu0 %vm156_vm0, %v43_v2  ;;  %v74_v9 = vld [vmem:[%s1747_s0 + $0x170] sm:$0xff]  ;;  %v15_v10 = vsel %vm14_vm1, %v13_v6, 0.0  ;;  %v41_v13 = vld [vmem:[%s1747_s0 + $0x68] sm:$0xff] }
   0x5   :  { %1061 = vmatpush3.xpose.msk.msra.mxu1 %vm156_vm0, %v75_v3  ;;  %1028 = vmatprep.subr.msk.mxu0 %vm156_vm0, %v58_v5  ;;  %v73_v14 = vld [vmem:[%s1747_s0 + $0x168] sm:$0xff]  ;;  %v56_v15 = vld [vmem:[%s1747_s0 + $0xe0] sm:$0xff]  ;;  %v55_v19 = vld [vmem:[%s1747_s0 + $0xd8] sm:$0xff] }
   0x6   :  { %1062 = vmatprep.subr.msk.mxu1 %vm156_vm0, %v90_v7  ;;  %16 = vadd.xlane.f32.xlu0 %v15_v10  ;;  %v88_v16 = vld [vmem:[%s1747_s0 + $0x1e0] sm:$0xff]  ;;  %v87_v20 = vld [vmem:[%s1747_s0 + $0x1d8] sm:$0xff]  ;;  %v54_v23 = vld [vmem:[%s1747_s0 + $0xd0] sm:$0xff] }
   0x7   :  { %v40_v17 = vld [vmem:[%s1747_s0 + $0x60] sm:$0xff]  ;;  %v39_v21 = vld [vmem:[%s1747_s0 + $0x58] sm:$0xff]  ;;  %v86_v24 = vld [vmem:[%s1747_s0 + $0x1d0] sm:$0xff] }
   0x8   :  { %1029 = vmatpush3.xpose.msk.msra.mxu0 %vm156_vm0, %v42_v8  ;;  %v72_v18 = vld [vmem:[%s1747_s0 + $0x160] sm:$0xff]  ;;  %v71_v22 = vld [vmem:[%s1747_s0 + $0x158] sm:$0xff]  ;;  %v38_v25 = vld [vmem:[%s1747_s0 + $0x50] sm:$0xff] }
   0x9   :  { %1063 = vmatpush3.xpose.msk.msra.mxu1 %vm156_vm0, %v74_v9  ;;  %1030 = vmatprep.subr.msk.mxu0 %vm156_vm0, %v57_v11  ;;  %v70_v26 = vld [vmem:[%s1747_s0 + $0x150] sm:$0xff]  ;;  %v53_v27 = vld [vmem:[%s1747_s0 + $0xc8] sm:$0xff]  ;;  %v52_v31 = vld [vmem:[%s1747_s0 + $0xc0] sm:$0xff] }
   0xa   :  { %1064 = vmatprep.subr.msk.mxu1 %vm156_vm0, %v89_v12  ;;  %v85_v28 = vld [vmem:[%s1747_s0 + $0x1c8] sm:$0xff]  ;;  %v84_v32 = vld [vmem:[%s1747_s0 + $0x1c0] sm:$0xff]  ;;  %v51_v35 = vld [vmem:[%s1747_s0 + $0xb8] sm:$0xff] }
   0xb   :  { %v37_v29 = vld [vmem:[%s1747_s0 + $0x48] sm:$0xff]  ;;  %v36_v33 = vld [vmem:[%s1747_s0 + $0x40] sm:$0xff]  ;;  %v83_v36 = vld [vmem:[%s1747_s0 + $0x1b8] sm:$0xff] }
   0xc   :  { %1031 = vmatpush3.xpose.msk.msra.mxu0 %vm156_vm0, %v41_v13  ;;  %v69_v30 = vld [vmem:[%s1747_s0 + $0x148] sm:$0xff]  ;;  %v68_v34 = vld [vmem:[%s1747_s0 + $0x140] sm:$0xff]  ;;  %v35_v37 = vld [vmem:[%s1747_s0 + $0x38] sm:$0xff] }
   0xd   :  { %1065 = vmatpush3.xpose.msk.msra.mxu1 %vm156_vm0, %v73_v14  ;;  %1032 = vmatprep.subr.msk.mxu0 %vm156_vm0, %v56_v15  ;;  %v67_v38 = vld [vmem:[%s1747_s0 + $0x138] sm:$0xff]  ;;  %v50_v39 = vld [vmem:[%s1747_s0 + $0xb0] sm:$0xff]  ;;  %v49_v43 = vld [vmem:[%s1747_s0 + $0xa8] sm:$0xff] }
   0xe   :  { %1066 = vmatprep.subr.msk.mxu1 %vm156_vm0, %v88_v16  ;;  %v82_v40 = vld [vmem:[%s1747_s0 + $0x1b0] sm:$0xff]  ;;  %v81_v44 = vld [vmem:[%s1747_s0 + $0x1a8] sm:$0xff]  ;;  %v48_v47 = vld [vmem:[%s1747_s0 + $0xa0] sm:$0xff] }
   0xf   :  { %v34_v41 = vld [vmem:[%s1747_s0 + $0x30] sm:$0xff]  ;;  %v33_v45 = vld [vmem:[%s1747_s0 + $0x28] sm:$0xff]  ;;  %v80_v48 = vld [vmem:[%s1747_s0 + $0x1a0] sm:$0xff] }
  0x10   :  { %1033 = vmatpush3.xpose.msk.msra.mxu0 %vm156_vm0, %v40_v17  ;;  %v66_v42 = vld [vmem:[%s1747_s0 + $0x130] sm:$0xff]  ;;  %v65_v46 = vld [vmem:[%s1747_s0 + $0x128] sm:$0xff]  ;;  %v32_v49 = vld [vmem:[%s1747_s0 + $0x20] sm:$0xff] }
  0x11   :  { %1067 = vmatpush3.xpose.msk.msra.mxu1 %vm156_vm0, %v72_v18  ;;  %1034 = vmatprep.subr.msk.mxu0 %vm156_vm0, %v55_v19  ;;  %v64_v50 = vld [vmem:[%s1747_s0 + $0x120] sm:$0xff] }
  0x12   :  { %1068 = vmatprep.subr.msk.mxu1 %vm156_vm0, %v87_v20 }
  0x14   :  { %1035 = vmatpush3.xpose.msk.msra.mxu0 %vm156_vm0, %v39_v21 }
  0x15   :  { %1069 = vmatpush3.xpose.msk.msra.mxu1 %vm156_vm0, %v71_v22  ;;  %1036 = vmatprep.subr.msk.mxu0 %vm156_vm0, %v54_v23 }
  0x16   :  { %1070 = vmatprep.subr.msk.mxu1 %vm156_vm0, %v86_v24 }
  0x18   :  { %1037 = vmatpush3.xpose.msk.msra.mxu0 %vm156_vm0, %v38_v25 }
  0x19   :  { %1071 = vmatpush3.xpose.msk.msra.mxu1 %vm156_vm0, %v70_v26  ;;  %1038 = vmatprep.subr.msk.mxu0 %vm156_vm0, %v53_v27 }
  0x1a   :  { %1072 = vmatprep.subr.msk.mxu1 %vm156_vm0, %v85_v28 }
  0x1c   :  { %1039 = vmatpush3.xpose.msk.msra.mxu0 %vm156_vm0, %v37_v29 }
  0x1d   :  { %1073 = vmatpush3.xpose.msk.msra.mxu1 %vm156_vm0, %v69_v30  ;;  %1040 = vmatprep.subr.msk.mxu0 %vm156_vm0, %v52_v31 }
  0x1e   :  { %1074 = vmatprep.subr.msk.mxu1 %vm156_vm0, %v84_v32 }
  0x20   :  { %1041 = vmatpush3.xpose.msk.msra.mxu0 %vm156_vm0, %v36_v33 }
  0x21   :  { %1075 = vmatpush3.xpose.msk.msra.mxu1 %vm156_vm0, %v68_v34  ;;  %1042 = vmatprep.subr.msk.mxu0 %vm156_vm0, %v51_v35 }
  0x22   :  { %1076 = vmatprep.subr.msk.mxu1 %vm156_vm0, %v83_v36 }
  0x24   :  { %1043 = vmatpush3.xpose.msk.msra.mxu0 %vm156_vm0, %v35_v37 }
  0x25   :  { %1077 = vmatpush3.xpose.msk.msra.mxu1 %vm156_vm0, %v67_v38  ;;  %1044 = vmatprep.subr.msk.mxu0 %vm156_vm0, %v50_v39 }
  0x26   :  { %1078 = vmatprep.subr.msk.mxu1 %vm156_vm0, %v82_v40 }
  0x28   :  { %1045 = vmatpush3.xpose.msk.msra.mxu0 %vm156_vm0, %v34_v41 }
  0x29   :  { %1079 = vmatpush3.xpose.msk.msra.mxu1 %vm156_vm0, %v66_v42  ;;  %1046 = vmatprep.subr.msk.mxu0 %vm156_vm0, %v49_v43 }
  0x2a   :  { %1080 = vmatprep.subr.msk.mxu1 %vm156_vm0, %v81_v44 }
  0x2c   :  { %1047 = vmatpush3.xpose.msk.msra.mxu0 %vm156_vm0, %v33_v45 }
  0x2d   :  { %1081 = vmatpush3.xpose.msk.msra.mxu1 %vm156_vm0, %v65_v46  ;;  %1048 = vmatprep.subr.msk.mxu0 %vm156_vm0, %v48_v47 }
  0x2e   :  { %1082 = vmatprep.subr.msk.mxu1 %vm156_vm0, %v80_v48 }
  0x2f   :  { %7 = vsyncpa [#allocation3], 0  ;;  %v47_v51 = vld [vmem:[%s1747_s0 + $0x98] sm:$0xff]  ;;  %v46_v55 = vld [vmem:[%s1747_s0 + $0x90] sm:$0xff]  ;;  %s1193_s7 = smov [#allocation2]  }
  0x30   :  { %v79_v52 = vld [vmem:[%s1747_s0 + $0x198] sm:$0xff]  ;;  %1049 = vmatpush3.xpose.msk.msra.mxu0 %vm156_vm0, %v32_v49  ;;  %v78_v56 = vld [vmem:[%s1747_s0 + $0x190] sm:$0xff]  ;;  %v45_v59 = vld [vmem:[%s1747_s0 + $0x88] sm:$0xff]  ;;  %s886_s8 = sshll.u32 %s1193_s7, 4  ;;  %s887_s8 = int_to_ptr.vmem [resolvable:$true] %s886_s8 }
  0x31   :  { %1083 = vmatpush3.xpose.msk.msra.mxu1 %vm156_vm0, %v64_v50  ;;  %1050 = vmatprep.subr.msk.mxu0 %vm156_vm0, %v47_v51  ;;  %v31_v53 = vld [vmem:[%s1747_s0 + $0x18] sm:$0xff]  ;;  %v30_v57 = vld [vmem:[%s1747_s0 + $0x10] sm:$0xff]  ;;  %v77_v60 = vld [vmem:[%s1747_s0 + $0x188] sm:$0xff]  ;;  %s1170_s9 = scalar_lea.vmem %s887_s8, 128  ;;  %p1175_p1 = scmp.lt.s32.totalorder %s887_s8, %s887_s8 }
  0x32   :  { %1084 = vmatprep.subr.msk.mxu1 %vm156_vm0, %v79_v52  ;;  %v63_v54 = vld [vmem:[%s1747_s0 + $0x118] sm:$0xff]  ;;  %v62_v58 = vld [vmem:[%s1747_s0 + $0x110] sm:$0xff]  ;;  %v29_v61 = vld [vmem:[%s1747_s0 + $0x8] sm:$0xff]  ;;  %p1171_p0 = scmp.ne.s32.totalorder %s887_s8, %s1170_s9  ;;  %p1176_p2 = scmp.lt.s32.totalorder %s1170_s9, %s1170_s9 }
  0x33   :  { %v61_v62 = vld [vmem:[%s1747_s0 + $0x108] sm:$0xff]  ;;  %v44_v63 = vld [vmem:[%s1747_s0 + $0x80] sm:$0xff]  ;;  %v123_v3 = vld [vmem:[%s1747_s0 + $0x2f8] sm:$0xff] }
  0x34   :  { %1051 = vmatpush3.xpose.msk.msra.mxu0 %vm156_vm0, %v31_v53  ;;  %v76_v0 = vld [vmem:[%s1747_s0 + $0x180] sm:$0xff]  ;;  %v155_v5 = vld [vmem:[%s1747_s0 + $0x3f8] sm:$0xff]  ;;  %v122_v8 = vld [vmem:[%s1747_s0 + $0x2f0] sm:$0xff]  ;;  %p1177_p3 = por %p1176_p2, %p1175_p1 }
  0x35   :  { %1085 = vmatpush3.xpose.msk.msra.mxu1 %vm156_vm0, %v63_v54  ;;  %1052 = vmatprep.subr.msk.mxu0 %vm156_vm0, %v46_v55  ;;  %v28_v1 = vld [vmem:[%s1747_s0] sm:$0xff]  ;;  %v107_v6 = vld [vmem:[%s1747_s0 + $0x278] sm:$0xff]  ;;  %v154_v9 = vld [vmem:[%s1747_s0 + $0x3f0] sm:$0xff] }
  0x36   :  { %1086 = vmatprep.subr.msk.mxu1 %vm156_vm0, %v78_v56  ;;  %v60_v2 = vld [vmem:[%s1747_s0 + $0x100] sm:$0xff]  ;;  %v139_v7 = vld [vmem:[%s1747_s0 + $0x378] sm:$0xff]  ;;  %v106_v10 = vld [vmem:[%s1747_s0 + $0x270] sm:$0xff]  ;;  %p1178_p4 = pnand %p1177_p3, %p1171_p0 }
  0x37   :  { %v138_v11 = vld [vmem:[%s1747_s0 + $0x370] sm:$0xff]  ;;  %v121_v12 = vld [vmem:[%s1747_s0 + $0x2e8] sm:$0xff]  ;;  %v120_v16 = vld [vmem:[%s1747_s0 + $0x2e0] sm:$0xff] }
  0x38   :  { %1053 = vmatpush3.xpose.msk.msra.mxu0 %vm156_vm0, %v30_v57  ;;  %v153_v13 = vld [vmem:[%s1747_s0 + $0x3e8] sm:$0xff]  ;;  %v152_v17 = vld [vmem:[%s1747_s0 + $0x3e0] sm:$0xff]  ;;  %v119_v20 = vld [vmem:[%s1747_s0 + $0x2d8] sm:$0xff] }
  0x39   :  { %1087 = vmatpush3.xpose.msk.msra.mxu1 %vm156_vm0, %v62_v58  ;;  %1054 = vmatprep.subr.msk.mxu0 %vm156_vm0, %v45_v59  ;;  %v105_v14 = vld [vmem:[%s1747_s0 + $0x268] sm:$0xff]  ;;  %v104_v18 = vld [vmem:[%s1747_s0 + $0x260] sm:$0xff]  ;;  %v151_v21 = vld [vmem:[%s1747_s0 + $0x3d8] sm:$0xff] }
  0x3a   :  { %1088 = vmatprep.subr.msk.mxu1 %vm156_vm0, %v77_v60  ;;  %v137_v15 = vld [vmem:[%s1747_s0 + $0x368] sm:$0xff]  ;;  %v136_v19 = vld [vmem:[%s1747_s0 + $0x360] sm:$0xff]  ;;  %v103_v22 = vld [vmem:[%s1747_s0 + $0x258] sm:$0xff] }
  0x3b   :  { %v135_v23 = vld [vmem:[%s1747_s0 + $0x358] sm:$0xff]  ;;  %v118_v24 = vld [vmem:[%s1747_s0 + $0x2d0] sm:$0xff]  ;;  %v117_v28 = vld [vmem:[%s1747_s0 + $0x2c8] sm:$0xff] }
  0x3c   :  { %1055 = vmatpush3.xpose.msk.msra.mxu0 %vm156_vm0, %v29_v61  ;;  %v150_v25 = vld [vmem:[%s1747_s0 + $0x3d0] sm:$0xff]  ;;  %v149_v29 = vld [vmem:[%s1747_s0 + $0x3c8] sm:$0xff]  ;;  %v116_v32 = vld [vmem:[%s1747_s0 + $0x2c0] sm:$0xff] }
  0x3d   :  { %1089 = vmatpush3.xpose.msk.msra.mxu1 %vm156_vm0, %v61_v62  ;;  %1056 = vmatprep.subr.msk.mxu0 %vm156_vm0, %v44_v63  ;;  %v102_v26 = vld [vmem:[%s1747_s0 + $0x250] sm:$0xff]  ;;  %v101_v30 = vld [vmem:[%s1747_s0 + $0x248] sm:$0xff]  ;;  %v148_v33 = vld [vmem:[%s1747_s0 + $0x3c0] sm:$0xff] }
  0x3e   :  { %1090 = vmatprep.subr.msk.mxu1 %vm156_vm0, %v76_v0  ;;  %v134_v27 = vld [vmem:[%s1747_s0 + $0x350] sm:$0xff]  ;;  %v133_v31 = vld [vmem:[%s1747_s0 + $0x348] sm:$0xff]  ;;  %v100_v34 = vld [vmem:[%s1747_s0 + $0x240] sm:$0xff] }
  0x3f   :  { %v132_v35 = vld [vmem:[%s1747_s0 + $0x340] sm:$0xff]  ;;  %v115_v36 = vld [vmem:[%s1747_s0 + $0x2b8] sm:$0xff]  ;;  %v114_v40 = vld [vmem:[%s1747_s0 + $0x2b0] sm:$0xff] }
  0x40   :  { %1057 = vmatpush3.xpose.msk.msra.mxu0 %vm156_vm0, %v28_v1  ;;  %v147_v37 = vld [vmem:[%s1747_s0 + $0x3b8] sm:$0xff]  ;;  %v146_v41 = vld [vmem:[%s1747_s0 + $0x3b0] sm:$0xff]  ;;  %v113_v44 = vld [vmem:[%s1747_s0 + $0x2a8] sm:$0xff] }
  0x41   :  { %1091 = vmatpush3.xpose.msk.msra.mxu1 %vm156_vm0, %v60_v2  ;;  %1094 = vmatprep.subr.msk.mxu0 %vm156_vm0, %v123_v3  ;;  %v99_v38 = vld [vmem:[%s1747_s0 + $0x238] sm:$0xff]  ;;  %v98_v42 = vld [vmem:[%s1747_s0 + $0x230] sm:$0xff]  ;;  %v145_v45 = vld [vmem:[%s1747_s0 + $0x3a8] sm:$0xff] }
  0x42   :  { %1128 = vmatprep.subr.msk.mxu1 %vm156_vm0, %v155_v5  ;;  %v131_v39 = vld [vmem:[%s1747_s0 + $0x338] sm:$0xff]  ;;  %v130_v43 = vld [vmem:[%s1747_s0 + $0x330] sm:$0xff]  ;;  %v97_v46 = vld [vmem:[%s1747_s0 + $0x228] sm:$0xff] }
  0x43   :  { %1059 = vmatmul.mubr.msk.f32.vlgmr.msra.gmra.mxu0 %vm156_vm0, %v1226_v4  ;;  %v129_v47 = vld [vmem:[%s1747_s0 + $0x328] sm:$0xff]  ;;  %v112_v48 = vld [vmem:[%s1747_s0 + $0x2a0] sm:$0xff]  ;;  %v111_v52 = vld [vmem:[%s1747_s0 + $0x298] sm:$0xff] }
  0x44   :  { %1093 = vmatmul.mubr.msk.f32.vlgmr.msra.gmra.mxu1 %vm156_vm0, %v1226_v4  ;;  %1095 = vmatpush3.xpose.msk.msra.mxu0 %vm156_vm0, %v107_v6  ;;  %v144_v49 = vld [vmem:[%s1747_s0 + $0x3a0] sm:$0xff]  ;;  %v143_v53 = vld [vmem:[%s1747_s0 + $0x398] sm:$0xff]  ;;  %v110_v56 = vld [vmem:[%s1747_s0 + $0x290] sm:$0xff] }
  0x45   :  { %1129 = vmatpush3.xpose.msk.msra.mxu1 %vm156_vm0, %v139_v7  ;;  %1096 = vmatprep.subr.msk.mxu0 %vm156_vm0, %v122_v8  ;;  %v96_v50 = vld [vmem:[%s1747_s0 + $0x220] sm:$0xff]  ;;  %v95_v54 = vld [vmem:[%s1747_s0 + $0x218] sm:$0xff]  ;;  %v142_v57 = vld [vmem:[%s1747_s0 + $0x390] sm:$0xff] }
  0x46   :  { %1130 = vmatprep.subr.msk.mxu1 %vm156_vm0, %v154_v9  ;;  %1126 = vmatprep.mubr.msk.f32.mxu0 %vm156_vm0, %v1226_v4  ;;  %v128_v51 = vld [vmem:[%s1747_s0 + $0x320] sm:$0xff]  ;;  %v127_v55 = vld [vmem:[%s1747_s0 + $0x318] sm:$0xff]  ;;  %v94_v58 = vld [vmem:[%s1747_s0 + $0x210] sm:$0xff] }
  0x47   :  { %1160 = vmatprep.mubr.msk.f32.mxu1 %vm156_vm0, %v1226_v4  ;;  %v126_v59 = vld [vmem:[%s1747_s0 + $0x310] sm:$0xff]  ;;  %v109_v60 = vld [vmem:[%s1747_s0 + $0x288] sm:$0xff]  ;;  %v108_v0 = vld [vmem:[%s1747_s0 + $0x280] sm:$0xff] }
  0x48   :  { %1097 = vmatpush3.xpose.msk.msra.mxu0 %vm156_vm0, %v106_v10  ;;  %v141_v61 = vld [vmem:[%s1747_s0 + $0x388] sm:$0xff]  ;;  %v140_v1 = vld [vmem:[%s1747_s0 + $0x380] sm:$0xff] }
  0x49   :  { %1131 = vmatpush3.xpose.msk.msra.mxu1 %vm156_vm0, %v138_v11  ;;  %1098 = vmatprep.subr.msk.mxu0 %vm156_vm0, %v121_v12  ;;  %v93_v62 = vld [vmem:[%s1747_s0 + $0x208] sm:$0xff]  ;;  %v92_v2 = vld [vmem:[%s1747_s0 + $0x200] sm:$0xff]  ;;  %v1192_v12 = vmov -inf  }
  0x4a   :  { %1132 = vmatprep.subr.msk.mxu1 %vm156_vm0, %v153_v13  ;;  %v125_v63 = vld [vmem:[%s1747_s0 + $0x308] sm:$0xff]  ;;  %v124_v3 = vld [vmem:[%s1747_s0 + $0x300] sm:$0xff]  ;;  %873 = vst [vmem:[#allocation2 + $0x1] sm:$0x1] %v1192_v12  ;;  %874 = vst [vmem:[#allocation2 + $0x2] sm:$0x1] %v1192_v12 }
  0x4b   :  { %875 = vst [vmem:[#allocation2 + $0x3] sm:$0x1] %v1192_v12  ;;  %876 = vst [vmem:[#allocation2 + $0x4] sm:$0x1] %v1192_v12 }
  0x4c   :  { %1099 = vmatpush3.xpose.msk.msra.mxu0 %vm156_vm0, %v105_v14  ;;  %877 = vst [vmem:[#allocation2 + $0x5] sm:$0x1] %v1192_v12  ;;  %878 = vst [vmem:[#allocation2 + $0x6] sm:$0x1] %v1192_v12 }
  0x4d   :  { %1133 = vmatpush3.xpose.msk.msra.mxu1 %vm156_vm0, %v137_v15  ;;  %1100 = vmatprep.subr.msk.mxu0 %vm156_vm0, %v120_v16  ;;  %879 = vst [vmem:[#allocation2 + $0x7] sm:$0x1] %v1192_v12 }
  0x4e   :  { %1134 = vmatprep.subr.msk.mxu1 %vm156_vm0, %v152_v17 }
  0x50   :  { %1101 = vmatpush3.xpose.msk.msra.mxu0 %vm156_vm0, %v104_v18  ;;  %v838_v18 = vlaneseq }
  0x51   :  { %1135 = vmatpush3.xpose.msk.msra.mxu1 %vm156_vm0, %v136_v19  ;;  %1102 = vmatprep.subr.msk.mxu0 %vm156_vm0, %v119_v20 }
  0x52   :  { %1136 = vmatprep.subr.msk.mxu1 %vm156_vm0, %v151_v21  ;;  %v839_v19 = vand.u32 127, %v838_v18 }
  0x54   :  { %1103 = vmatpush3.xpose.msk.msra.mxu0 %vm156_vm0, %v103_v22  ;;  %vm856_vm2 = vcmp.lt.s32.totalorder %v839_v19, 16 }
  0x55   :  { %1137 = vmatpush3.xpose.msk.msra.mxu1 %vm156_vm0, %v135_v23  ;;  %1104 = vmatprep.subr.msk.mxu0 %vm156_vm0, %v118_v24 }
  0x56   :  { %1138 = vmatprep.subr.msk.mxu1 %vm156_vm0, %v150_v25 }
  0x58   :  { %1105 = vmatpush3.xpose.msk.msra.mxu0 %vm156_vm0, %v102_v26 }
  0x59   :  { %1139 = vmatpush3.xpose.msk.msra.mxu1 %vm156_vm0, %v134_v27  ;;  %1106 = vmatprep.subr.msk.mxu0 %vm156_vm0, %v117_v28 }
  0x5a   :  { %1140 = vmatprep.subr.msk.mxu1 %vm156_vm0, %v149_v29 }
  0x5c   :  { %1107 = vmatpush3.xpose.msk.msra.mxu0 %vm156_vm0, %v101_v30 }
  0x5d   :  { %1141 = vmatpush3.xpose.msk.msra.mxu1 %vm156_vm0, %v133_v31  ;;  %1108 = vmatprep.subr.msk.mxu0 %vm156_vm0, %v116_v32 }
  0x5e   :  { %1142 = vmatprep.subr.msk.mxu1 %vm156_vm0, %v148_v33 }
  0x60   :  { %1109 = vmatpush3.xpose.msk.msra.mxu0 %vm156_vm0, %v100_v34 }
  0x61   :  { %1143 = vmatpush3.xpose.msk.msra.mxu1 %vm156_vm0, %v132_v35  ;;  %1110 = vmatprep.subr.msk.mxu0 %vm156_vm0, %v115_v36 }
  0x62   :  { %1144 = vmatprep.subr.msk.mxu1 %vm156_vm0, %v147_v37 }
  0x64   :  { %1111 = vmatpush3.xpose.msk.msra.mxu0 %vm156_vm0, %v99_v38 }
  0x65   :  { %1145 = vmatpush3.xpose.msk.msra.mxu1 %vm156_vm0, %v131_v39  ;;  %1112 = vmatprep.subr.msk.mxu0 %vm156_vm0, %v114_v40 }
  0x66   :  { %1146 = vmatprep.subr.msk.mxu1 %vm156_vm0, %v146_v41 }
  0x68   :  { %1113 = vmatpush3.xpose.msk.msra.mxu0 %vm156_vm0, %v98_v42 }
  0x69   :  { %1147 = vmatpush3.xpose.msk.msra.mxu1 %vm156_vm0, %v130_v43  ;;  %1114 = vmatprep.subr.msk.mxu0 %vm156_vm0, %v113_v44 }
  0x6a   :  { %1148 = vmatprep.subr.msk.mxu1 %vm156_vm0, %v145_v45 }
  0x6c   :  { %1115 = vmatpush3.xpose.msk.msra.mxu0 %vm156_vm0, %v97_v46 }
  0x6d   :  { %1149 = vmatpush3.xpose.msk.msra.mxu1 %vm156_vm0, %v129_v47  ;;  %1116 = vmatprep.subr.msk.mxu0 %vm156_vm0, %v112_v48 }
  0x6e   :  { %1150 = vmatprep.subr.msk.mxu1 %vm156_vm0, %v144_v49 }
  0x70   :  { %1117 = vmatpush3.xpose.msk.msra.mxu0 %vm156_vm0, %v96_v50 }
  0x71   :  { %1151 = vmatpush3.xpose.msk.msra.mxu1 %vm156_vm0, %v128_v51  ;;  %1118 = vmatprep.subr.msk.mxu0 %vm156_vm0, %v111_v52 }
  0x72   :  { %1152 = vmatprep.subr.msk.mxu1 %vm156_vm0, %v143_v53 }
  0x74   :  { %1119 = vmatpush3.xpose.msk.msra.mxu0 %vm156_vm0, %v95_v54 }
  0x75   :  { %1153 = vmatpush3.xpose.msk.msra.mxu1 %vm156_vm0, %v127_v55  ;;  %1120 = vmatprep.subr.msk.mxu0 %vm156_vm0, %v110_v56 }
  0x76   :  { %1154 = vmatprep.subr.msk.mxu1 %vm156_vm0, %v142_v57 }
  0x78   :  { %1121 = vmatpush3.xpose.msk.msra.mxu0 %vm156_vm0, %v94_v58 }
  0x79   :  { %1155 = vmatpush3.xpose.msk.msra.mxu1 %vm156_vm0, %v126_v59  ;;  %1122 = vmatprep.subr.msk.mxu0 %vm156_vm0, %v109_v60 }
  0x7a   :  { %1156 = vmatprep.subr.msk.mxu1 %vm156_vm0, %v141_v61 }
  0x7c   :  { %1123 = vmatpush3.xpose.msk.msra.mxu0 %vm156_vm0, %v93_v62 }
  0x7d   :  { %1157 = vmatpush3.xpose.msk.msra.mxu1 %vm156_vm0, %v125_v63  ;;  %1124 = vmatprep.subr.msk.mxu0 %vm156_vm0, %v108_v0 }
  0x7e   :  { %1158 = vmatprep.subr.msk.mxu1 %vm156_vm0, %v140_v1 }
  0x80   :  { %1125 = vmatpush3.xpose.msk.msra.mxu0 %vm156_vm0, %v92_v2 }
  0x81   :  { %1159 = vmatpush3.xpose.msk.msra.mxu1 %vm156_vm0, %v124_v3 }
  0x83   :  { %1127 = vmatmul.mubr.msk.f32.vlgmr.msra.gmra.mxu0 %vm156_vm0, %v1226_v4 }
  0x84   :  { %1161 = vmatmul.mubr.msk.f32.vlgmr.msra.gmra.mxu1 %vm156_vm0, %v1226_v4 }
  0x8f   :  { %v17_v5 = vpop.xlane.xlu0 %16 }
  0x90   :  { %v18_v6 = vrot.slane %v17_v5, 4 }
  0x92   :  { %v19_v7 = vadd.f32 %v18_v6, %v17_v5 }
  0x94   :  { %v20_v8 = vrot.slane %v19_v7, 2 }
  0x96   :  { %v21_v9 = vadd.f32 %v20_v8, %v19_v7 }
  0x98   :  { %v22_v10 = vrot.slane %v21_v9, 1 }
  0x9a   :  { %v23_v11 = vadd.f32 %v22_v10, %v21_v9 }
  0x9c   :  { %1162 = vpush %v23_v11 }
  0xcd   :  { %s1163_s0 = spop %1162 }
  0xce   :  { %v25_v13 = vstv %s1163_s0 }
  0xcf   :  { %1168 = vrsqrt.f32 %v25_v13 }
  0xdc   :  { %v1169_v4 = vpop.eup %1168 }
  0xdd   :  { %1164 = vpush %v1169_v4 }
 0x103   :  { %v610_v14 = vpop.f32.mrf.mxu0 }
 0x104   :  { %v681_v15 = vpop.f32.mrf.mxu1 }
 0x105   :  { %v612_v16 = vpop.f32.mrf.mxu0 }
 0x106   :  { %v683_v17 = vpop.f32.mrf.mxu1 }
 0x10e   :  { %s1165_s6 = spop %1164 }
 0x10f   :  { %v828_v20 = vstv %s1165_s6 }
 0x110   :  { %v829_v21 = vmul.f32 %v828_v20, %v610_v14 }
 0x112   :  { %v864_v22 = vsel %vm856_vm2, %v829_v21, -inf }
 0x113   :  { %872 = vst [vmem:[#allocation2] sm:$0x1] %v864_v22 }
 0x114   :  { %1181 = shalt.err (!%p1178_p4)
}
 0x115   :  { %889 = dma.vmem_to_hbm [thread:$0]  %s887_s8, 128, %s1749_s2, [#allocation3]  }
 0x143   :  { %v752_v23 = vpop.f32.mrf.mxu0 }
 0x144   :  { %v823_v24 = vpop.f32.mrf.mxu1 }
 0x145   :  { %v754_v25 = vpop.f32.mrf.mxu0 }
 0x146   :  { %v825_v26 = vpop.f32.mrf.mxu1 }
 0x147   :  { %1190 = dma.done.wait [#allocation3], 128  }
 0x148   :  { %1191 = vsyncadd [#allocation3], 4294967168 }
 0x149   :  { %893 = vsyncpa [#allocation3], 1 }

</bundles_post_ra>
